<compile_context>
chip_gen: v6e
topology: v6e:2x2x1
jax: 0.10.0
libtpu: 0.0.40
codegen_flags: <defaults>
</compile_context>

<pallas_src>
import numpy as np

import jax
import jax.numpy as jnp
from jax.experimental import pallas as pl
from jax.experimental.pallas import tpu as pltpu  # noqa: F401  (TPU backend)

LANES = 128
_EPS = 1e-5


# ----------------------------------------------------------------------------
# The fused Pallas kernel: entire forward pass, intermediates VMEM/vreg resident.
# ----------------------------------------------------------------------------
def _build_kernel(ntaps, gs):
    """ntaps = number of 8x8 input tiles per sample (conv3 spatial positions),
    gs = row-group stride per tile (batch padded up to a multiple of 8)."""
    f32 = jnp.float32

    def kernel(a0_ref, w1_ref, w2_ref, w3_ref, wfc1_ref, wfc2_ref, wfc3_ref,
               b1_ref, b2_ref, b3_ref, bf1_ref, bf2_ref, bf3_ref, o_ref):

        def mm(x, w_ref):  # bf16 weights are upcast on-chip; accumulate in f32
            return jnp.dot(x, w_ref[...].astype(f32), preferred_element_type=f32)

        # conv1 + BN + ReLU: block-diagonal weight over the 16 conv1 positions of a tile
        y = jnp.maximum(mm(a0_ref[...], w1_ref) + b1_ref[...], 0.0)      # (ntaps*gs, 96)
        # conv2 + BN + ReLU: tap-packed lanes -> one matmul
        y = jnp.maximum(mm(y, w2_ref) + b2_ref[...], 0.0)                # (ntaps*gs, 64)
        # conv3 + BN + ReLU
        y = jnp.maximum(mm(y, w3_ref) + b3_ref[...], 0.0)                # (ntaps*gs, 32)

        # fc1 with the NCHW flatten folded into per-tile weight slices:
        # ntaps independent, accumulating matmuls over tile-aligned row groups.
        acc = jnp.dot(y[0:gs, :], wfc1_ref[0].astype(f32),
                      preferred_element_type=f32)
        for t in range(1, ntaps):
            acc = acc + jnp.dot(y[t * gs:(t + 1) * gs, :],
                                wfc1_ref[t].astype(f32),
                                preferred_element_type=f32)
        y = jnp.maximum(acc + bf1_ref[...], 0.0)                         # (gs, 128)

        # fc2 + ReLU
        y = jnp.maximum(mm(y, wfc2_ref) + bf2_ref[...], 0.0)             # (gs, 64)
        # fc3 (logits), lane-dense 128-wide output
        o_ref[...] = mm(y, wfc3_ref) + bf3_ref[...]                      # (gs, 128)

    return kernel


# ----------------------------------------------------------------------------
# Trace-time constant folding: BN fold, tap packing, flatten folding (numpy, eager).
# ----------------------------------------------------------------------------
def _fold_params(params, num_classes, ntaps):
    f32 = np.float32

    def bn_fold(gamma, beta, mean, var, bias):
        s = gamma / np.sqrt(var + _EPS)
        return s, (bias - mean) * s + beta

    # conv1: 1->6, k=2, s=2.  Within an 8x8 tile there are 16 output positions p=(i1,j1).
    cw, cb, g, be, mu, var = (np.asarray(a, f32) for a in params["conv1"])
    s1, sh1 = bn_fold(g, be, mu, var, cb)
    w1_small = np.transpose(cw[:, 0], (1, 2, 0)).reshape(4, 6) * s1[None, :]  # [kh*2+kw, c]
    w1 = np.kron(np.eye(16, dtype=f32), w1_small)                             # (64, 96)
    b1 = np.tile(sh1, 16)                                                     # (96,)

    # conv2: 6->16.  Input lanes = p1*6 + cin, output lanes = q*16 + cout (q over 2x2).
    cw, cb, g, be, mu, var = (np.asarray(a, f32) for a in params["conv2"])
    s2, sh2 = bn_fold(g, be, mu, var, cb)
    w2 = np.zeros((96, 64), f32)
    for i2 in range(2):
        for j2 in range(2):
            q = i2 * 2 + j2
            for kh in range(2):
                for kw in range(2):
                    p1 = (2 * i2 + kh) * 4 + (2 * j2 + kw)
                    w2[p1 * 6:(p1 + 1) * 6, q * 16:(q + 1) * 16] = \
                        cw[:, :, kh, kw].T * s2[None, :]
    b2 = np.tile(sh2, 4)                                                      # (64,)

    # conv3: 16->32.  One output position per tile; K = 4 taps * 16 cin = 64 (dense).
    cw, cb, g, be, mu, var = (np.asarray(a, f32) for a in params["conv3"])
    s3, sh3 = bn_fold(g, be, mu, var, cb)
    w3 = np.zeros((64, 32), f32)
    for kh in range(2):
        for kw in range(2):
            q = kh * 2 + kw
            w3[q * 16:(q + 1) * 16, :] = cw[:, :, kh, kw].T * s3[None, :]
    b3 = sh3                                                                  # (32,)

    # fc1: PyTorch NCHW flatten index f = c*ntaps + t  ->  per-tile slices (ntaps, 32, 128)
    fw1, fb1 = (np.asarray(a, f32) for a in params["fc1"])                    # (128, 32*ntaps)
    wfc1 = fw1.T.reshape(32, ntaps, 128).transpose(1, 0, 2)                   # (ntaps, 32, 128)
    bf1 = fb1                                                                 # (128,)

    fw2, bf2 = (np.asarray(a, f32) for a in params["fc2"])
    wfc2 = fw2.T                                                              # (128, 64)

    fw3, fb3 = (np.asarray(a, f32) for a in params["fc3"])
    wfc3 = np.zeros((64, LANES), f32)                                         # lane-dense out
    wfc3[:, :num_classes] = fw3.T
    bf3 = np.zeros((LANES,), f32)
    bf3[:num_classes] = fb3

    def w(a):  # matmul operands in bf16 (halves constant DMA; f32 accumulate in-kernel)
        return jnp.asarray(a, dtype=jnp.bfloat16)

    def b(a):  # bias / shift adds stay f32
        return jnp.asarray(a, dtype=jnp.float32).reshape(1, -1)

    return (w(w1), w(w2), w(w3), w(wfc1), w(wfc2), w(wfc3),
            b(b1), b(b2), b(b3), b(bf1), b(np.asarray(bf2, f32)), b(bf3))


def _blockize(windows, h3, w3, gs):
    """(B, bins, wl) -> (h3*w3*gs, 64): row = tile*gs + b, lane = (i1*4+j1)*4 + kh*2 + kw."""
    b = windows.shape[0]
    x = windows.astype(jnp.float32).reshape(b, h3, 4, 2, w3, 4, 2)   # (b,i3,i1,kh,j3,j1,kw)
    x = jnp.transpose(x, (1, 4, 0, 2, 5, 3, 6))                      # (i3,j3,b,i1,j1,kh,kw)
    x = x.reshape(h3 * w3, b, 64)
    x = jnp.pad(x, ((0, 0), (0, gs - b), (0, 0)))                    # align tile groups to 8
    return x.reshape(h3 * w3 * gs, 64)


def _full_spec(shape):
    idx = (0,) * len(shape)
    return pl.BlockSpec(shape, lambda *_: idx)


def make_forward(params, num_classes, batch, bins, wl):
    """Returns a jitted windows -> logits function using one fused, grid-less pallas_call."""
    assert bins % 8 == 0 and wl % 8 == 0, "geometry must divide by 8 (three k=2,s=2 convs)"
    h3, w3 = bins // 8, wl // 8
    ntaps = h3 * w3
    assert params["fc1"][0].shape[1] == 32 * ntaps
    gs = max(8, ((batch + 7) // 8) * 8)          # tile-group row stride (sublane aligned)

    consts = _fold_params(params, num_classes, ntaps)
    kernel = _build_kernel(ntaps, gs)

    def fwd(windows):
        a0 = _blockize(windows, h3, w3, gs)
        args = (a0,) + consts
        out = pl.pallas_call(
            kernel,
            out_shape=jax.ShapeDtypeStruct((gs, LANES), jnp.float32),
            in_specs=[_full_spec(a.shape) for a in args],
            out_specs=_full_spec((gs, LANES)),
        )(*args)
        return out[:batch, :num_classes]

    return jax.jit(fwd)


# ----------------------------------------------------------------------------
# Pure-JAX reference (independent path: lax.conv) for a numerical sanity check.
# ----------------------------------------------------------------------------
def _reference_forward(params, windows, eps=_EPS):
    hp = jax.lax.Precision.HIGHEST
    b = windows.shape[0]
    x = windows.reshape(b, 1, windows.shape[1], windows.shape[2]).astype(jnp.float32)

    def conv_bn_relu(x, p):
        w, cb, g, be, mu, var = p
        y = jax.lax.conv_general_dilated(
            x, w.astype(jnp.float32), window_strides=(2, 2), padding="VALID",
            dimension_numbers=("NCHW", "OIHW", "NCHW"), precision=hp)
        y = y + cb.reshape(1, -1, 1, 1)
        y = (y - mu.reshape(1, -1, 1, 1)) / jnp.sqrt(var.reshape(1, -1, 1, 1) + eps)
        y = y * g.reshape(1, -1, 1, 1) + be.reshape(1, -1, 1, 1)
        return jnp.maximum(y, 0.0)

    x = conv_bn_relu(x, params["conv1"])
    x = conv_bn_relu(x, params["conv2"])
    x = conv_bn_relu(x, params["conv3"])
    x = x.reshape(b, -1)
    w1, b1 = params["fc1"]
    x = jnp.maximum(jnp.dot(x, w1.T, precision=hp) + b1, 0.0)
    w2, b2 = params["fc2"]
    x = jnp.maximum(jnp.dot(x, w2.T, precision=hp) + b2, 0.0)
    w3, b3 = params["fc3"]
    return jnp.dot(x, w3.T, precision=hp) + b3


# ----------------------------------------------------------------------------
# Deterministic parameter initialization (shapes from the PyTorch __init__).
# ----------------------------------------------------------------------------
def init_params(key, num_classes):
    def next_key():
        nonlocal key
        key, sub = jax.random.split(key)
        return sub

    def nrm(shape, scale=0.1):
        return (scale * jax.random.normal(next_key(), shape)).astype(jnp.float32)

    def conv_params(cin, cout):
        return (nrm((cout, cin, 2, 2)), nrm((cout,)),
                1.0 + nrm((cout,), 0.05), nrm((cout,), 0.05),
                nrm((cout,), 0.05), 1.0 + jnp.abs(nrm((cout,), 0.05)))

    return {
        "conv1": conv_params(1, 6),
        "conv2": conv_params(6, 16),
        "conv3": conv_params(16, 32),
        "fc1": (nrm((128, 160)), nrm((128,))),      # torch Linear: (out, in)
        "fc2": (nrm((64, 128)), nrm((64,))),
        "fc3": (nrm((num_classes, 64)), nrm((num_classes,))),
    }


# ----------------------------------------------------------------------------
if __name__ == "__main__":
    num_classes = 10
    batch, bins, window_length = 2, 40, 8            # 40/8 * 8/8 * 32 = 160 -> fc1 in_features
    key = jax.random.PRNGKey(0)
    pkey, xkey = jax.random.split(key)

    params = init_params(pkey, num_classes)
    windows = jax.random.normal(xkey, (batch, bins, window_length), dtype=jnp.float32)

    forward = make_forward(params, num_classes, batch, bins, window_length)
    logits = jax.block_until_ready(forward(windows))

    assert logits.shape == (batch, num_classes), logits.shape
    assert bool(jnp.all(jnp.isfinite(logits)))

    ref = _reference_forward(params, windows)
    assert bool(jnp.allclose(logits, ref, rtol=2e-2, atol=2e-2)), (
        float(jnp.max(jnp.abs(logits - ref))))

    print("KERNEL_OK")
</pallas_src>

<mosaic_0001>
module attributes {stable_mosaic.version = 11 : i64} {
  func.func @kernel(%arg0: memref<40x64xf32, #tpu.memory_space<vmem>>, %arg1: memref<64x96xbf16, #tpu.memory_space<vmem>>, %arg2: memref<96x64xbf16, #tpu.memory_space<vmem>>, %arg3: memref<64x32xbf16, #tpu.memory_space<vmem>>, %arg4: memref<5x32x128xbf16, #tpu.memory_space<vmem>>, %arg5: memref<128x64xbf16, #tpu.memory_space<vmem>>, %arg6: memref<64x128xbf16, #tpu.memory_space<vmem>>, %arg7: memref<1x96xf32, #tpu.memory_space<vmem>>, %arg8: memref<1x64xf32, #tpu.memory_space<vmem>>, %arg9: memref<1x32xf32, #tpu.memory_space<vmem>>, %arg10: memref<1x128xf32, #tpu.memory_space<vmem>>, %arg11: memref<1x64xf32, #tpu.memory_space<vmem>>, %arg12: memref<1x128xf32, #tpu.memory_space<vmem>>, %arg13: memref<8x128xf32, #tpu.memory_space<vmem>>) attributes {dimension_semantics = [], scalar_prefetch = 0 : i64, scratch_operands = 0 : i64, tpu.core_type = #tpu.core_type<tc>} {
    %c0 = arith.constant 0 : index
    %c0_0 = arith.constant 0 : index
    %0 = vector.load %arg0[%c0, %c0_0] : memref<40x64xf32, #tpu.memory_space<vmem>>, vector<40x64xf32>
    %c0_1 = arith.constant 0 : index
    %c0_2 = arith.constant 0 : index
    %1 = vector.load %arg1[%c0_1, %c0_2] : memref<64x96xbf16, #tpu.memory_space<vmem>>, vector<64x96xbf16>
    %2 = arith.extf %1 : vector<64x96xbf16> to vector<64x96xf32>
    %cst = arith.constant dense<0.000000e+00> : vector<40x96xf32>
    %3 = tpu.matmul %0, %2, %cst {dimension_numbers = #tpu.dot_dimension_numbers<[1], [0], [0], [1], [0, 0, 1, 1], [], []>} : vector<40x64xf32>, vector<64x96xf32>, vector<40x96xf32> -> vector<40x96xf32>
    %c0_3 = arith.constant 0 : index
    %c0_4 = arith.constant 0 : index
    %4 = vector.load %arg7[%c0_3, %c0_4] : memref<1x96xf32, #tpu.memory_space<vmem>>, vector<1x96xf32>
    %5 = vector.broadcast %4 : vector<1x96xf32> to vector<40x96xf32>
    %6 = arith.addf %3, %5 : vector<40x96xf32>
    %cst_5 = arith.constant 0.000000e+00 : f32
    %7 = vector.broadcast %cst_5 : f32 to vector<40x96xf32>
    %8 = arith.maximumf %6, %7 : vector<40x96xf32>
    %c0_6 = arith.constant 0 : index
    %c0_7 = arith.constant 0 : index
    %9 = vector.load %arg2[%c0_6, %c0_7] : memref<96x64xbf16, #tpu.memory_space<vmem>>, vector<96x64xbf16>
    %10 = arith.extf %9 : vector<96x64xbf16> to vector<96x64xf32>
    %cst_8 = arith.constant dense<0.000000e+00> : vector<40x64xf32>
    %11 = tpu.matmul %8, %10, %cst_8 {dimension_numbers = #tpu.dot_dimension_numbers<[1], [0], [0], [1], [0, 0, 1, 1], [], []>} : vector<40x96xf32>, vector<96x64xf32>, vector<40x64xf32> -> vector<40x64xf32>
    %c0_9 = arith.constant 0 : index
    %c0_10 = arith.constant 0 : index
    %12 = vector.load %arg8[%c0_9, %c0_10] : memref<1x64xf32, #tpu.memory_space<vmem>>, vector<1x64xf32>
    %13 = vector.broadcast %12 : vector<1x64xf32> to vector<40x64xf32>
    %14 = arith.addf %11, %13 : vector<40x64xf32>
    %cst_11 = arith.constant 0.000000e+00 : f32
    %15 = vector.broadcast %cst_11 : f32 to vector<40x64xf32>
    %16 = arith.maximumf %14, %15 : vector<40x64xf32>
    %c0_12 = arith.constant 0 : index
    %c0_13 = arith.constant 0 : index
    %17 = vector.load %arg3[%c0_12, %c0_13] : memref<64x32xbf16, #tpu.memory_space<vmem>>, vector<64x32xbf16>
    %18 = arith.extf %17 : vector<64x32xbf16> to vector<64x32xf32>
    %cst_14 = arith.constant dense<0.000000e+00> : vector<40x32xf32>
    %19 = tpu.matmul %16, %18, %cst_14 {dimension_numbers = #tpu.dot_dimension_numbers<[1], [0], [0], [1], [0, 0, 1, 1], [], []>} : vector<40x64xf32>, vector<64x32xf32>, vector<40x32xf32> -> vector<40x32xf32>
    %c0_15 = arith.constant 0 : index
    %c0_16 = arith.constant 0 : index
    %20 = vector.load %arg9[%c0_15, %c0_16] : memref<1x32xf32, #tpu.memory_space<vmem>>, vector<1x32xf32>
    %21 = vector.broadcast %20 : vector<1x32xf32> to vector<40x32xf32>
    %22 = arith.addf %19, %21 : vector<40x32xf32>
    %cst_17 = arith.constant 0.000000e+00 : f32
    %23 = vector.broadcast %cst_17 : f32 to vector<40x32xf32>
    %24 = arith.maximumf %22, %23 : vector<40x32xf32>
    %25 = vector.extract_strided_slice %24 {offsets = [0, 0], sizes = [8, 32], strides = [1, 1]} : vector<40x32xf32> to vector<8x32xf32>
    %c0_18 = arith.constant 0 : index
    %c0_19 = arith.constant 0 : index
    %c0_20 = arith.constant 0 : index
    %26 = vector.load %arg4[%c0_18, %c0_19, %c0_20] : memref<5x32x128xbf16, #tpu.memory_space<vmem>>, vector<1x32x128xbf16>
    %27 = vector.shape_cast %26 : vector<1x32x128xbf16> to vector<32x128xbf16>
    %28 = arith.extf %27 : vector<32x128xbf16> to vector<32x128xf32>
    %cst_21 = arith.constant dense<0.000000e+00> : vector<8x128xf32>
    %29 = tpu.matmul %25, %28, %cst_21 {dimension_numbers = #tpu.dot_dimension_numbers<[1], [0], [0], [1], [0, 0, 1, 1], [], []>} : vector<8x32xf32>, vector<32x128xf32>, vector<8x128xf32> -> vector<8x128xf32>
    %30 = vector.extract_strided_slice %24 {offsets = [8, 0], sizes = [8, 32], strides = [1, 1]} : vector<40x32xf32> to vector<8x32xf32>
    %c1 = arith.constant 1 : index
    %c0_22 = arith.constant 0 : index
    %c0_23 = arith.constant 0 : index
    %31 = vector.load %arg4[%c1, %c0_22, %c0_23] : memref<5x32x128xbf16, #tpu.memory_space<vmem>>, vector<1x32x128xbf16>
    %32 = vector.shape_cast %31 : vector<1x32x128xbf16> to vector<32x128xbf16>
    %33 = arith.extf %32 : vector<32x128xbf16> to vector<32x128xf32>
    %cst_24 = arith.constant dense<0.000000e+00> : vector<8x128xf32>
    %34 = tpu.matmul %30, %33, %cst_24 {dimension_numbers = #tpu.dot_dimension_numbers<[1], [0], [0], [1], [0, 0, 1, 1], [], []>} : vector<8x32xf32>, vector<32x128xf32>, vector<8x128xf32> -> vector<8x128xf32>
    %35 = arith.addf %29, %34 : vector<8x128xf32>
    %36 = vector.extract_strided_slice %24 {offsets = [16, 0], sizes = [8, 32], strides = [1, 1]} : vector<40x32xf32> to vector<8x32xf32>
    %c2 = arith.constant 2 : index
    %c0_25 = arith.constant 0 : index
    %c0_26 = arith.constant 0 : index
    %37 = vector.load %arg4[%c2, %c0_25, %c0_26] : memref<5x32x128xbf16, #tpu.memory_space<vmem>>, vector<1x32x128xbf16>
    %38 = vector.shape_cast %37 : vector<1x32x128xbf16> to vector<32x128xbf16>
    %39 = arith.extf %38 : vector<32x128xbf16> to vector<32x128xf32>
    %cst_27 = arith.constant dense<0.000000e+00> : vector<8x128xf32>
    %40 = tpu.matmul %36, %39, %cst_27 {dimension_numbers = #tpu.dot_dimension_numbers<[1], [0], [0], [1], [0, 0, 1, 1], [], []>} : vector<8x32xf32>, vector<32x128xf32>, vector<8x128xf32> -> vector<8x128xf32>
    %41 = arith.addf %35, %40 : vector<8x128xf32>
    %42 = vector.extract_strided_slice %24 {offsets = [24, 0], sizes = [8, 32], strides = [1, 1]} : vector<40x32xf32> to vector<8x32xf32>
    %c3 = arith.constant 3 : index
    %c0_28 = arith.constant 0 : index
    %c0_29 = arith.constant 0 : index
    %43 = vector.load %arg4[%c3, %c0_28, %c0_29] : memref<5x32x128xbf16, #tpu.memory_space<vmem>>, vector<1x32x128xbf16>
    %44 = vector.shape_cast %43 : vector<1x32x128xbf16> to vector<32x128xbf16>
    %45 = arith.extf %44 : vector<32x128xbf16> to vector<32x128xf32>
    %cst_30 = arith.constant dense<0.000000e+00> : vector<8x128xf32>
    %46 = tpu.matmul %42, %45, %cst_30 {dimension_numbers = #tpu.dot_dimension_numbers<[1], [0], [0], [1], [0, 0, 1, 1], [], []>} : vector<8x32xf32>, vector<32x128xf32>, vector<8x128xf32> -> vector<8x128xf32>
    %47 = arith.addf %41, %46 : vector<8x128xf32>
    %48 = vector.extract_strided_slice %24 {offsets = [32, 0], sizes = [8, 32], strides = [1, 1]} : vector<40x32xf32> to vector<8x32xf32>
    %c4 = arith.constant 4 : index
    %c0_31 = arith.constant 0 : index
    %c0_32 = arith.constant 0 : index
    %49 = vector.load %arg4[%c4, %c0_31, %c0_32] : memref<5x32x128xbf16, #tpu.memory_space<vmem>>, vector<1x32x128xbf16>
    %50 = vector.shape_cast %49 : vector<1x32x128xbf16> to vector<32x128xbf16>
    %51 = arith.extf %50 : vector<32x128xbf16> to vector<32x128xf32>
    %cst_33 = arith.constant dense<0.000000e+00> : vector<8x128xf32>
    %52 = tpu.matmul %48, %51, %cst_33 {dimension_numbers = #tpu.dot_dimension_numbers<[1], [0], [0], [1], [0, 0, 1, 1], [], []>} : vector<8x32xf32>, vector<32x128xf32>, vector<8x128xf32> -> vector<8x128xf32>
    %53 = arith.addf %47, %52 : vector<8x128xf32>
    %c0_34 = arith.constant 0 : index
    %c0_35 = arith.constant 0 : index
    %54 = vector.load %arg10[%c0_34, %c0_35] : memref<1x128xf32, #tpu.memory_space<vmem>>, vector<1x128xf32>
    %55 = vector.broadcast %54 : vector<1x128xf32> to vector<8x128xf32>
    %56 = arith.addf %53, %55 : vector<8x128xf32>
    %cst_36 = arith.constant 0.000000e+00 : f32
    %57 = vector.broadcast %cst_36 : f32 to vector<8x128xf32>
    %58 = arith.maximumf %56, %57 : vector<8x128xf32>
    %c0_37 = arith.constant 0 : index
    %c0_38 = arith.constant 0 : index
    %59 = vector.load %arg5[%c0_37, %c0_38] : memref<128x64xbf16, #tpu.memory_space<vmem>>, vector<128x64xbf16>
    %60 = arith.extf %59 : vector<128x64xbf16> to vector<128x64xf32>
    %cst_39 = arith.constant dense<0.000000e+00> : vector<8x64xf32>
    %61 = tpu.matmul %58, %60, %cst_39 {dimension_numbers = #tpu.dot_dimension_numbers<[1], [0], [0], [1], [0, 0, 1, 1], [], []>} : vector<8x128xf32>, vector<128x64xf32>, vector<8x64xf32> -> vector<8x64xf32>
    %c0_40 = arith.constant 0 : index
    %c0_41 = arith.constant 0 : index
    %62 = vector.load %arg11[%c0_40, %c0_41] : memref<1x64xf32, #tpu.memory_space<vmem>>, vector<1x64xf32>
    %63 = vector.broadcast %62 : vector<1x64xf32> to vector<8x64xf32>
    %64 = arith.addf %61, %63 : vector<8x64xf32>
    %cst_42 = arith.constant 0.000000e+00 : f32
    %65 = vector.broadcast %cst_42 : f32 to vector<8x64xf32>
    %66 = arith.maximumf %64, %65 : vector<8x64xf32>
    %c0_43 = arith.constant 0 : index
    %c0_44 = arith.constant 0 : index
    %67 = vector.load %arg6[%c0_43, %c0_44] : memref<64x128xbf16, #tpu.memory_space<vmem>>, vector<64x128xbf16>
    %68 = arith.extf %67 : vector<64x128xbf16> to vector<64x128xf32>
    %cst_45 = arith.constant dense<0.000000e+00> : vector<8x128xf32>
    %69 = tpu.matmul %66, %68, %cst_45 {dimension_numbers = #tpu.dot_dimension_numbers<[1], [0], [0], [1], [0, 0, 1, 1], [], []>} : vector<8x64xf32>, vector<64x128xf32>, vector<8x128xf32> -> vector<8x128xf32>
    %c0_46 = arith.constant 0 : index
    %c0_47 = arith.constant 0 : index
    %70 = vector.load %arg12[%c0_46, %c0_47] : memref<1x128xf32, #tpu.memory_space<vmem>>, vector<1x128xf32>
    %71 = vector.broadcast %70 : vector<1x128xf32> to vector<8x128xf32>
    %72 = arith.addf %69, %71 : vector<8x128xf32>
    %c0_48 = arith.constant 0 : index
    %c0_49 = arith.constant 0 : index
    %73 = vector.load %arg13[%c0_48, %c0_49] : memref<8x128xf32, #tpu.memory_space<vmem>>, vector<8x128xf32>
    tpu.vector_store %arg13[%c0_48, %c0_49], %72 {strides = array<i32>} : memref<8x128xf32, #tpu.memory_space<vmem>>, vector<8x128xf32>,
    return
  }
}

</mosaic_0001>

<bundles_post_ra>
// kernel: fwd.1
= control target key start
LH: loop header
LB: loop body
LE: loop exit
PB: predicated region body
PF: predicated region fallthrough
CT: control target
= control target key end

     0   :  { %v1614_v0 = vmov 0.0   ;;  %vm1615_vm0 = vmmov 0   ;;  %vm72_vm1 = vcmask 523264   ;;  %vm214_vm2 = vcmask 785408   ;;  %s1967_s1 = inlined_call_operand.vmem [shape: bf16[64,96], index: 1, kind: input, shape index: {}]   ;;  %s1968_s2 = inlined_call_operand.vmem [shape: bf16[96,64], index: 2, kind: input, shape index: {}]   ;;  %s1969_s0 = inlined_call_operand.vmem [shape: f32[40,64], index: 0, kind: input, shape index: {}]   ;;  %s1970_s3 = inlined_call_operand.vmem [shape: bf16[64,32], index: 3, kind: input, shape index: {}]   ;;  %s1971_s7 = inlined_call_operand.vmem [shape: f32[1,96], index: 7, kind: input, shape index: {}]   ;;  %s1972_s4 = inlined_call_operand.vmem [shape: bf16[5,32,128], index: 4, kind: input, shape index: {}]   ;;  %s1973_s8 = inlined_call_operand.vmem [shape: f32[1,64], index: 8, kind: input, shape index: {}]   ;;  %s1974_s9 = inlined_call_operand.vmem [shape: f32[1,32], index: 9, kind: input, shape index: {}]   ;;  %s1975_s5 = inlined_call_operand.vmem [shape: bf16[128,64], index: 5, kind: input, shape index: {}]   ;;  %s1976_s6 = inlined_call_operand.vmem [shape: bf16[64,128], index: 6, kind: input, shape index: {}]   ;;  %s1977_s10 = inlined_call_operand.vmem [shape: f32[1,128], index: 10, kind: input, shape index: {}]   ;;  %s1978_s11 = inlined_call_operand.vmem [shape: f32[1,64], index: 11, kind: input, shape index: {}]   ;;  %s1979_s12 = inlined_call_operand.vmem [shape: f32[1,128], index: 12, kind: input, shape index: {}]   ;;  %s1980_s13 = inlined_call_operand.vmem [shape: f32[8,128], index: 13, kind: output, shape index: {}]  }
   0x1   :  { %1402 = vmatprep.subr.mxu0 %v1614_v0  ;;  %v1280_v1 = vld [vmem:[%s1967_s1 + $0x18] sm:$0xff]   ;;  %v1279_v2 = vld [vmem:[%s1967_s1 + $0x10] sm:$0xff]   ;;  %1418 = vmatprep.mubr.msk.f32.mxu0 %vm1615_vm0, %v1614_v0  ;;  %v1285_v6 = vld [vmem:[%s1968_s2 + $0x28] sm:$0xff]   ;;  %vm475_vm3 = vcmask 261120  }
   0x2   :  { %v1148_v3 = vunpack.c.l.bf16 %v1280_v1  ;;  %v1149_v4 = vunpack.c.h.bf16 %v1280_v1  ;;  %1433 = vmatprep.subr.mxu1 %v1614_v0  ;;  %1457 = vmatprep.mubr.msk.f32.mxu1 %vm1615_vm0, %v1614_v0  ;;  %v1145_v5 = vunpack.c.h.bf16 %v1279_v2  ;;  %v1284_v7 = vld [vmem:[%s1968_s2 + $0x20] sm:$0xff]   ;;  %v1278_v8 = vld [vmem:[%s1967_s1 + $0x8] sm:$0xff]   ;;  %v1172_v9 = vunpack.c.l.bf16 %v1285_v6  ;;  %v1283_v14 = vld [vmem:[%s1968_s2 + $0x18] sm:$0xff]  }
   0x3   :  { %v1173_v10 = vunpack.c.h.bf16 %v1285_v6  ;;  %v1144_v11 = vunpack.c.l.bf16 %v1279_v2  ;;  %v1169_v12 = vunpack.c.h.bf16 %v1284_v7  ;;  %v1141_v13 = vunpack.c.h.bf16 %v1278_v8  ;;  %v1135_v15 = vld [vmem:[%s1967_s1] sm:$0xff]   ;;  %v1282_v20 = vld [vmem:[%s1968_s2 + $0x10] sm:$0xff]   ;;  %v1281_v25 = vld [vmem:[%s1968_s2 + $0x8] sm:$0xff]  }
   0x4   :  { %1403 = vmatpush3.msra.mxu0 %v1149_v4  ;;  %v1168_v16 = vunpack.c.l.bf16 %v1284_v7  ;;  %v1140_v17 = vunpack.c.l.bf16 %v1278_v8  ;;  %v1165_v18 = vunpack.c.h.bf16 %v1283_v14  ;;  %v1137_v19 = vunpack.c.h.bf16 %v1135_v15  ;;  %v44_v24 = vld [vmem:[%s1969_s0] sm:$0xff]  ;;  %v45_v28 = vld [vmem:[%s1969_s0 + $0x8] sm:$0xff]  ;;  %v46_v29 = vld [vmem:[%s1969_s0 + $0x10] sm:$0xff] }
   0x5   :  { %1404 = vmatprep.subr.mxu0 %v1614_v0  ;;  %1434 = vmatpush3.msra.mxu1 %v1173_v10  ;;  %v1164_v21 = vunpack.c.l.bf16 %v1283_v14  ;;  %v1136_v22 = vunpack.c.l.bf16 %v1135_v15  ;;  %v1161_v23 = vunpack.c.h.bf16 %v1282_v20  ;;  %v1160_v26 = vunpack.c.l.bf16 %v1282_v20  ;;  %v47_v30 = vld [vmem:[%s1969_s0 + $0x18] sm:$0xff]  ;;  %v48_v31 = vld [vmem:[%s1969_s0 + $0x20] sm:$0xff]  ;;  %v1287_v37 = vld [vmem:[%s1970_s3 + $0x10] sm:$0xff]  }
   0x6   :  { %1405 = vmatpush3.msra.mxu0 %v1148_v3  ;;  %1435 = vmatprep.subr.mxu1 %v1614_v0  ;;  %v1157_v27 = vunpack.c.h.bf16 %v1281_v25  ;;  %v1156_v32 = vunpack.c.l.bf16 %v1281_v25  ;;  %v1151_v33 = vld [vmem:[%s1968_s2] sm:$0xff]   ;;  %v1288_v36 = vld [vmem:[%s1970_s3 + $0x18] sm:$0xff]   ;;  %v1185_v40 = vunpack.c.h.bf16 %v1287_v37  ;;  %v1286_v41 = vld [vmem:[%s1970_s3 + $0x8] sm:$0xff]   ;;  %v1184_v42 = vunpack.c.l.bf16 %v1287_v37 }
   0x7   :  { %1406 = vmatprep.subr.mxu0 %v1614_v0  ;;  %1436 = vmatpush3.msra.mxu1 %v1172_v9  ;;  %v1153_v34 = vunpack.c.h.bf16 %v1151_v33  ;;  %v1152_v35 = vunpack.c.l.bf16 %v1151_v33  ;;  %v1189_v38 = vunpack.c.h.bf16 %v1288_v36  ;;  %v1188_v39 = vunpack.c.l.bf16 %v1288_v36  ;;  %v1091_v45 = vld [vmem:[%s1971_s7] ss:$0 sm:$0xff]  ;;  %v1289_v6 = vld [vmem:[%s1972_s4 + $0x8] sm:$0xff]   ;;  %v1291_v9 = vld [vmem:[%s1972_s4 + $0x18] sm:$0xff]  }
   0x8   :  { %1407 = vmatpush3.msra.mxu0 %v1145_v5  ;;  %1437 = vmatprep.subr.mxu1 %v1614_v0  ;;  %v1181_v43 = vunpack.c.h.bf16 %v1286_v41  ;;  %v1180_v44 = vunpack.c.l.bf16 %v1286_v41  ;;  %v1175_v3 = vld [vmem:[%s1970_s3] sm:$0xff]   ;;  %v1197_v7 = vunpack.c.h.bf16 %v1289_v6  ;;  %v1290_v15 = vld [vmem:[%s1972_s4 + $0x10] sm:$0xff]  }
   0x9   :  { %1408 = vmatprep.subr.mxu0 %v1614_v0  ;;  %1438 = vmatpush3.msra.mxu1 %v1169_v12  ;;  %v1177_v4 = vunpack.c.h.bf16 %v1175_v3  ;;  %v1176_v5 = vunpack.c.l.bf16 %v1175_v3  ;;  %v1097_v8 = vld [vmem:[%s1973_s8] ss:$0 sm:$0xff]  ;;  %v1201_v20 = vunpack.c.h.bf16 %v1290_v15 }
   0xa   :  { %1409 = vmatpush3.msra.mxu0 %v1144_v11  ;;  %1439 = vmatprep.subr.mxu1 %v1614_v0 }
   0xb   :  { %1410 = vmatprep.subr.mxu0 %v1614_v0  ;;  %1440 = vmatpush3.msra.mxu1 %v1168_v16 }
   0xc   :  { %1411 = vmatpush3.msra.mxu0 %v1141_v13  ;;  %1441 = vmatprep.subr.mxu1 %v1614_v0  ;;  %v1205_v13 = vunpack.c.h.bf16 %v1291_v9 }
   0xd   :  { %1412 = vmatprep.subr.mxu0 %v1614_v0  ;;  %1442 = vmatpush3.msra.mxu1 %v1165_v18 }
   0xe   :  { %1413 = vmatpush3.msra.mxu0 %v1140_v17  ;;  %1443 = vmatprep.subr.mxu1 %v1614_v0  ;;  %v1204_v17 = vunpack.c.l.bf16 %v1291_v9 }
   0xf   :  { %1414 = vmatprep.subr.mxu0 %v1614_v0  ;;  %1444 = vmatpush3.msra.mxu1 %v1164_v21 }
  0x10   :  { %1415 = vmatpush3.msra.mxu0 %v1137_v19  ;;  %1445 = vmatprep.subr.mxu1 %v1614_v0 }
  0x11   :  { %1416 = vmatprep.subr.mxu0 %v1614_v0  ;;  %1446 = vmatpush3.msra.mxu1 %v1161_v23 }
  0x12   :  { %1417 = vmatpush3.msra.mxu0 %v1136_v22  ;;  %1447 = vmatprep.subr.mxu1 %v1614_v0 }
  0x13   :  { %1419 = vmatmul.mubr.msk.f32.vlgmr.msra.gmra.mxu0 %vm72_vm1, %v44_v24  ;;  %1448 = vmatpush3.msra.mxu1 %v1160_v26 }
  0x14   :  { %1421 = vmatprep.mubr.msk.f32.mxu0 %vm1615_vm0, %v1614_v0  ;;  %1472 = vmatprep.subr.mxu0 %v1614_v0 }
  0x15   :  { %1449 = vmatprep.subr.mxu1 %v1614_v0  ;;  %1473 = vmatpush3.msra.mxu0 %v1189_v38  ;;  %v1200_v38 = vunpack.c.l.bf16 %v1290_v15 }
  0x16   :  { %1450 = vmatpush3.msra.mxu1 %v1157_v27  ;;  %1474 = vmatprep.subr.mxu0 %v1614_v0 }
  0x17   :  { %1422 = vmatmul.mubr.msk.f32.gmra.mxu0 %vm72_vm1, %v45_v28  ;;  %1451 = vmatprep.subr.mxu1 %v1614_v0 }
  0x18   :  { %1424 = vmatprep.mubr.msk.f32.mxu0 %vm1615_vm0, %v1614_v0  ;;  %1452 = vmatpush3.msra.mxu1 %v1156_v32 }
  0x19   :  { %1453 = vmatprep.subr.mxu1 %v1614_v0  ;;  %1475 = vmatpush3.msra.mxu0 %v1188_v39  ;;  %v1103_v39 = vld [vmem:[%s1974_s9] ss:$0 sm:$0xff] }
  0x1a   :  { %1454 = vmatpush3.msra.mxu1 %v1153_v34  ;;  %1476 = vmatprep.subr.mxu0 %v1614_v0  ;;  %v1196_v34 = vunpack.c.l.bf16 %v1289_v6 }
  0x1b   :  { %1425 = vmatmul.mubr.msk.f32.gmra.mxu0 %vm72_vm1, %v46_v29  ;;  %1455 = vmatprep.subr.mxu1 %v1614_v0 }
  0x1c   :  { %1427 = vmatprep.mubr.msk.f32.mxu0 %vm1615_vm0, %v1614_v0  ;;  %1456 = vmatpush3.msra.mxu1 %v1152_v35  ;;  %v1191_v35 = vld [vmem:[%s1972_s4] sm:$0xff]  }
  0x1d   :  { %1514 = vmatprep.subr.mxu1 %v1614_v0  ;;  %1477 = vmatpush3.msra.mxu0 %v1185_v40  ;;  %v1193_v36 = vunpack.c.h.bf16 %v1191_v35  ;;  %v1192_v37 = vunpack.c.l.bf16 %v1191_v35  ;;  %v1295_v40 = vld [vmem:[%s1972_s4 + $0x38] sm:$0xff]  }
  0x1e   :  { %1478 = vmatprep.subr.mxu0 %v1614_v0 }
  0x1f   :  { %1428 = vmatmul.mubr.msk.f32.gmra.mxu0 %vm72_vm1, %v47_v30 }
  0x20   :  { %1430 = vmatprep.mubr.msk.f32.mxu0 %vm1615_vm0, %v1614_v0  ;;  %1479 = vmatpush3.msra.mxu0 %v1184_v42 }
  0x21   :  { %1480 = vmatprep.subr.mxu0 %v1614_v0 }
  0x22   :  { %1481 = vmatpush3.msra.mxu0 %v1181_v43 }
  0x23   :  { %1431 = vmatmul.mubr.msk.f32.gmra.mxu0 %vm72_vm1, %v48_v31  ;;  %1482 = vmatprep.subr.mxu0 %v1614_v0 }
  0x24   :  { %1488 = vmatprep.mubr.msk.f32.mxu0 %vm1615_vm0, %v1614_v0  ;;  %1483 = vmatpush3.msra.mxu0 %v1180_v44  ;;  %v1221_v44 = vunpack.c.h.bf16 %v1295_v40 }
  0x25   :  { %1484 = vmatprep.subr.mxu0 %v1614_v0 }
  0x26   :  { %1485 = vmatpush3.msra.mxu0 %v1177_v4  ;;  %v1304_v4 = vld [vmem:[%s1975_s5 + $0x38] sm:$0xff]  }
  0x27   :  { %1486 = vmatprep.subr.mxu0 %v1614_v0 }
  0x28   :  { %1487 = vmatpush3.msra.mxu0 %v1176_v5 }
  0x29   :  { %1503 = vmatprep.subr.mxu0 %v1614_v0 }
  0xd3   :  { %v154_v46 = vpop.f32.mrf.mxu0 }
  0xd4   :  { %v155_v47 = vadd.f32 %v1091_v45, %v154_v46  ;;  %v1293_v46 = vld [vmem:[%s1972_s4 + $0x28] sm:$0xff]  }
  0xd5   :  { %v1420_v48 = vpop.f32.mrf.mxu0 }
  0xd6   :  { %v178_v49 = vmax.f32 %v155_v47, 0.0  ;;  %v1220_v48 = vunpack.c.l.bf16 %v1295_v40  ;;  %v1306_v40 = vld [vmem:[%s1976_s6 + $0x10] sm:$0xff]  }
  0xd7   :  { %v159_v50 = vpop.f32.mrf.mxu0 }
  0xd8   :  { %v160_v51 = vadd.f32 %v1091_v45, %v159_v50  ;;  %1458 = vmatmul.mubr.msk.f32.vlgmr.msra.gmra.mxu1 %vm214_vm2, %v178_v49  ;;  %v1294_v49 = vld [vmem:[%s1972_s4 + $0x30] sm:$0xff]  }
  0xd9   :  { %v1423_v52 = vpop.f32.mrf.mxu0  ;;  %1460 = vmatprep.mubr.msk.f32.mxu1 %vm1615_vm0, %v1614_v0  ;;  %1515 = vmatpush3.msra.mxu1 %v1197_v7 }
  0xda   :  { %v179_v53 = vmax.f32 %v160_v51, 0.0  ;;  %1516 = vmatprep.subr.mxu1 %v1614_v0  ;;  %v1213_v52 = vunpack.c.h.bf16 %v1293_v46 }
  0xdb   :  { %v164_v54 = vpop.f32.mrf.mxu0  ;;  %1517 = vmatpush3.msra.mxu1 %v1196_v34 }
  0xdc   :  { %v165_v55 = vadd.f32 %v1091_v45, %v164_v54  ;;  %1461 = vmatmul.mubr.msk.f32.gmra.mxu1 %vm214_vm2, %v179_v53  ;;  %1518 = vmatprep.subr.mxu1 %v1614_v0  ;;  %v1292_v54 = vld [vmem:[%s1972_s4 + $0x20] sm:$0xff]  }
  0xdd   :  { %v1426_v56 = vpop.f32.mrf.mxu0  ;;  %1463 = vmatprep.mubr.msk.f32.mxu1 %vm1615_vm0, %v1614_v0  ;;  %1519 = vmatpush3.msra.mxu1 %v1193_v36  ;;  %v1231_v36 = vld [vmem:[%s1975_s5] sm:$0xff]  }
  0xde   :  { %v180_v57 = vmax.f32 %v165_v55, 0.0  ;;  %1520 = vmatprep.subr.mxu1 %v1614_v0  ;;  %v1217_v55 = vunpack.c.h.bf16 %v1294_v49 }
  0xdf   :  { %v169_v58 = vpop.f32.mrf.mxu0  ;;  %1521 = vmatpush3.msra.mxu1 %v1192_v37  ;;  %v1233_v37 = vunpack.c.h.bf16 %v1231_v36 }
  0xe0   :  { %v170_v59 = vadd.f32 %v1091_v45, %v169_v58  ;;  %1464 = vmatmul.mubr.msk.f32.gmra.mxu1 %vm214_vm2, %v180_v57  ;;  %1536 = vmatprep.subr.mxu1 %v1614_v0  ;;  %v1212_v57 = vunpack.c.l.bf16 %v1293_v46 }
  0xe1   :  { %v1429_v60 = vpop.f32.mrf.mxu0  ;;  %1466 = vmatprep.mubr.msk.f32.mxu1 %vm1615_vm0, %v1614_v0 }
  0xe2   :  { %v181_v61 = vmax.f32 %v170_v59, 0.0  ;;  %v1216_v59 = vunpack.c.l.bf16 %v1294_v49 }
  0xe3   :  { %v174_v62 = vpop.f32.mrf.mxu0 }
  0xe4   :  { %v175_v63 = vadd.f32 %v1091_v45, %v174_v62  ;;  %1467 = vmatmul.mubr.msk.f32.gmra.mxu1 %vm214_vm2, %v181_v61  ;;  %v1209_v61 = vunpack.c.h.bf16 %v1292_v54  ;;  %v1297_v62 = vld [vmem:[%s1972_s4 + $0x48] sm:$0xff]  }
  0xe5   :  { %v1432_v1 = vpop.f32.mrf.mxu0  ;;  %1469 = vmatprep.mubr.msk.f32.mxu1 %vm1615_vm0, %v1614_v0  ;;  %v1229_v6 = vunpack.c.h.bf16 %v1297_v62 }
  0xe6   :  { %v182_v2 = vmax.f32 %v175_v63, 0.0  ;;  %v1208_v1 = vunpack.c.l.bf16 %v1292_v54 }
  0xe8   :  { %1470 = vmatmul.mubr.msk.f32.gmra.mxu1 %vm214_vm2, %v182_v2 }
  0xe9   :  { %1522 = vmatprep.mubr.msk.f32.mxu1 %vm1615_vm0, %v1614_v0 }
 0x198   :  { %v296_v10 = vpop.f32.mrf.mxu1 }
 0x199   :  { %v297_v11 = vadd.f32 %v1097_v8, %v296_v10  ;;  %v1228_v10 = vunpack.c.l.bf16 %v1297_v62 }
 0x19a   :  { %v1459_v12 = vpop.f32.mrf.mxu1 }
 0x19b   :  { %v320_v14 = vmax.f32 %v297_v11, 0.0  ;;  %v1261_v11 = vunpack.c.h.bf16 %v1304_v4 }
 0x19c   :  { %v301_v16 = vpop.f32.mrf.mxu1 }
 0x19d   :  { %v302_v18 = vadd.f32 %v1097_v8, %v301_v16  ;;  %1489 = vmatmul.mubr.msk.f32.vlgmr.msra.gmra.mxu0 %vm72_vm1, %v320_v14  ;;  %v1260_v16 = vunpack.c.l.bf16 %v1304_v4 }
 0x19e   :  { %v1462_v19 = vpop.f32.mrf.mxu1  ;;  %1491 = vmatprep.mubr.msk.f32.mxu0 %vm1615_vm0, %v1614_v0  ;;  %1504 = vmatpush3.msra.mxu0 %v1205_v13  ;;  %v1303_v13 = vld [vmem:[%s1975_s5 + $0x30] sm:$0xff]  }
 0x19f   :  { %v321_v21 = vmax.f32 %v302_v18, 0.0  ;;  %1505 = vmatprep.subr.mxu0 %v1614_v0  ;;  %v1257_v18 = vunpack.c.h.bf16 %v1303_v13 }
 0x1a0   :  { %v306_v22 = vpop.f32.mrf.mxu1  ;;  %1506 = vmatpush3.msra.mxu0 %v1204_v17 }
 0x1a1   :  { %v307_v23 = vadd.f32 %v1097_v8, %v306_v22  ;;  %1492 = vmatmul.mubr.msk.f32.gmra.mxu0 %vm72_vm1, %v321_v21  ;;  %1507 = vmatprep.subr.mxu0 %v1614_v0  ;;  %v1302_v21 = vld [vmem:[%s1975_s5 + $0x28] sm:$0xff]  }
 0x1a2   :  { %v1465_v24 = vpop.f32.mrf.mxu1  ;;  %1494 = vmatprep.mubr.msk.f32.mxu0 %vm1615_vm0, %v1614_v0  ;;  %1508 = vmatpush3.msra.mxu0 %v1201_v20  ;;  %v1256_v20 = vunpack.c.l.bf16 %v1303_v13  ;;  %v1253_v22 = vunpack.c.h.bf16 %v1302_v21 }
 0x1a3   :  { %v322_v25 = vmax.f32 %v307_v23, 0.0  ;;  %1509 = vmatprep.subr.mxu0 %v1614_v0  ;;  %v1252_v23 = vunpack.c.l.bf16 %v1302_v21  ;;  %v1301_v24 = vld [vmem:[%s1975_s5 + $0x20] sm:$0xff]  }
 0x1a4   :  { %v311_v26 = vpop.f32.mrf.mxu1  ;;  %1510 = vmatpush3.msra.mxu0 %v1200_v38  ;;  %v1232_v38 = vunpack.c.l.bf16 %v1231_v36 }
 0x1a5   :  { %v312_v27 = vadd.f32 %v1097_v8, %v311_v26  ;;  %1495 = vmatmul.mubr.msk.f32.gmra.mxu0 %vm72_vm1, %v322_v25  ;;  %1525 = vmatprep.subr.mxu0 %v1614_v0  ;;  %v1249_v25 = vunpack.c.h.bf16 %v1301_v24  ;;  %v1248_v26 = vunpack.c.l.bf16 %v1301_v24 }
 0x1a6   :  { %v1468_v28 = vpop.f32.mrf.mxu1  ;;  %1497 = vmatprep.mubr.msk.f32.mxu0 %vm1615_vm0, %v1614_v0 }
 0x1a7   :  { %v323_v29 = vmax.f32 %v312_v27, 0.0  ;;  %v1300_v27 = vld [vmem:[%s1975_s5 + $0x18] sm:$0xff]  }
 0x1a8   :  { %v316_v30 = vpop.f32.mrf.mxu1  ;;  %v1245_v28 = vunpack.c.h.bf16 %v1300_v27 }
 0x1a9   :  { %v317_v31 = vadd.f32 %v1097_v8, %v316_v30  ;;  %1498 = vmatmul.mubr.msk.f32.gmra.mxu0 %vm72_vm1, %v323_v29  ;;  %v1296_v8 = vld [vmem:[%s1972_s4 + $0x40] sm:$0xff]   ;;  %v1244_v29 = vunpack.c.l.bf16 %v1300_v27  ;;  %v1299_v30 = vld [vmem:[%s1975_s5 + $0x10] sm:$0xff]  }
 0x1aa   :  { %v1471_v32 = vpop.f32.mrf.mxu1  ;;  %1500 = vmatprep.mubr.msk.f32.mxu0 %vm1615_vm0, %v1614_v0  ;;  %v1225_v15 = vunpack.c.h.bf16 %v1296_v8  ;;  %v1224_v17 = vunpack.c.l.bf16 %v1296_v8 }
 0x1ab   :  { %v324_v33 = vmax.f32 %v317_v31, 0.0  ;;  %v1241_v31 = vunpack.c.h.bf16 %v1299_v30  ;;  %v1240_v32 = vunpack.c.l.bf16 %v1299_v30 }
 0x1ad   :  { %1501 = vmatmul.mubr.msk.f32.gmra.mxu0 %vm72_vm1, %v324_v33  ;;  %v1298_v33 = vld [vmem:[%s1975_s5 + $0x8] sm:$0xff]  }
 0x1ae   :  { %1511 = vmatprep.mubr.msk.f32.mxu0 %vm1615_vm0, %v1614_v0  ;;  %v1237_v34 = vunpack.c.h.bf16 %v1298_v33  ;;  %v1236_v35 = vunpack.c.l.bf16 %v1298_v33 }
 0x25d   :  { %v429_v41 = vpop.f32.mrf.mxu0 }
 0x25e   :  { %v430_v42 = vadd.f32 %v1103_v39, %v429_v41 }
 0x25f   :  { %v1490_v43 = vpop.f32.mrf.mxu0 }
 0x260   :  { %v453_v45 = vmax.f32 %v430_v42, 0.0  ;;  %v1273_v43 = vunpack.c.h.bf16 %v1306_v40 }
 0x261   :  { %v434_v47 = vpop.f32.mrf.mxu0 }
 0x262   :  { %v435_v50 = vadd.f32 %v1103_v39, %v434_v47  ;;  %1523 = vmatmul.mubr.msk.f32.vlgmr.msra.gmra.mxu1 %vm475_vm3, %v453_v45  ;;  %v1272_v45 = vunpack.c.l.bf16 %v1306_v40 }
 0x263   :  { %v1493_v51 = vpop.f32.mrf.mxu0  ;;  %1537 = vmatpush3.msra.mxu1 %v1221_v44  ;;  %1544 = vmatprep.mubr.msk.f32.mxu1 %vm1615_vm0, %v1614_v0  ;;  %v1305_v44 = vld [vmem:[%s1976_s6 + $0x8] sm:$0xff]  }
 0x264   :  { %v454_v53 = vmax.f32 %v435_v50, 0.0  ;;  %1538 = vmatprep.subr.mxu1 %v1614_v0  ;;  %v1269_v46 = vunpack.c.h.bf16 %v1305_v44 }
 0x265   :  { %v439_v56 = vpop.f32.mrf.mxu0  ;;  %1539 = vmatpush3.msra.mxu1 %v1220_v48 }
 0x266   :  { %v440_v58 = vadd.f32 %v1103_v39, %v439_v56  ;;  %1512 = vmatmul.mubr.msk.f32.vlgmr.msra.gmra.mxu0 %vm475_vm3, %v454_v53  ;;  %1540 = vmatprep.subr.mxu1 %v1614_v0 }
 0x267   :  { %1526 = vmatpush3.msra.mxu0 %v1213_v52  ;;  %v1496_v60 = vpop.f32.mrf.mxu0  ;;  %1533 = vmatprep.mubr.msk.f32.mxu0 %vm1615_vm0, %v1614_v0 }
 0x268   :  { %1527 = vmatprep.subr.mxu0 %v1614_v0  ;;  %1541 = vmatpush3.msra.mxu1 %v1217_v55  ;;  %v455_v2 = vmax.f32 %v440_v58, 0.0 }
 0x269   :  { %1528 = vmatpush3.msra.mxu0 %v1212_v57  ;;  %v444_v63 = vpop.f32.mrf.mxu0  ;;  %1542 = vmatprep.subr.mxu1 %v1614_v0 }
 0x26a   :  { %1529 = vmatprep.subr.mxu0 %v1614_v0  ;;  %v445_v3 = vadd.f32 %v1103_v39, %v444_v63  ;;  %1543 = vmatpush3.msra.mxu1 %v1216_v59  ;;  %v1130_v59 = vld [vmem:[%s1977_s10] ss:$0 sm:$0xff] }
 0x26b   :  { %1530 = vmatpush3.msra.mxu0 %v1209_v61  ;;  %v1499_v5 = vpop.f32.mrf.mxu0  ;;  %1558 = vmatprep.subr.mxu1 %v1614_v0 }
 0x26c   :  { %v456_v7 = vmax.f32 %v445_v3, 0.0  ;;  %1531 = vmatprep.subr.mxu0 %v1614_v0  ;;  %v1131_v5 = vld [vmem:[%s1978_s11] ss:$0 sm:$0xff] }
 0x26d   :  { %1532 = vmatpush3.msra.mxu0 %v1208_v1  ;;  %v449_v9 = vpop.f32.mrf.mxu0  ;;  %v1268_v1 = vunpack.c.l.bf16 %v1305_v44 }
 0x26e   :  { %1534 = vmatmul.mubr.msk.f32.vlgmr.msra.gmra.mxu0 %vm475_vm3, %v455_v2  ;;  %1547 = vmatprep.subr.mxu0 %v1614_v0  ;;  %v450_v12 = vadd.f32 %v1103_v39, %v449_v9  ;;  %v1307_v39 = vld [vmem:[%s1976_s6 + $0x18] sm:$0xff]   ;;  %v1263_v2 = vld [vmem:[%s1976_s6] sm:$0xff]  }
 0x26f   :  { %1548 = vmatpush3.msra.mxu0 %v1229_v6  ;;  %1545 = vmatmul.mubr.msk.f32.vlgmr.msra.gmra.mxu1 %vm475_vm3, %v456_v7  ;;  %v1502_v14 = vpop.f32.mrf.mxu0  ;;  %v1277_v41 = vunpack.c.h.bf16 %v1307_v39  ;;  %v1276_v42 = vunpack.c.l.bf16 %v1307_v39  ;;  %v1265_v3 = vunpack.c.h.bf16 %v1263_v2  ;;  %v1264_v4 = vunpack.c.l.bf16 %v1263_v2 }
 0x270   :  { %1549 = vmatprep.subr.mxu0 %v1614_v0  ;;  %1555 = vmatprep.mubr.msk.f32.mxu0 %vm1615_vm0, %v1614_v0  ;;  %v457_v19 = vmax.f32 %v450_v12, 0.0 }
 0x271   :  { %1550 = vmatpush3.msra.mxu0 %v1228_v10  ;;  %1559 = vmatpush3.msra.mxu1 %v1261_v11  ;;  %v1132_v10 = vld [vmem:[%s1979_s12] ss:$0 sm:$0xff] }
 0x272   :  { %1551 = vmatprep.subr.mxu0 %v1614_v0  ;;  %1560 = vmatprep.subr.mxu1 %v1614_v0 }
 0x273   :  { %1552 = vmatpush3.msra.mxu0 %v1225_v15  ;;  %1561 = vmatpush3.msra.mxu1 %v1260_v16 }
 0x274   :  { %1553 = vmatprep.subr.mxu0 %v1614_v0  ;;  %1562 = vmatprep.subr.mxu1 %v1614_v0 }
 0x275   :  { %1554 = vmatpush3.msra.mxu0 %v1224_v17  ;;  %1563 = vmatpush3.msra.mxu1 %v1257_v18 }
 0x276   :  { %1556 = vmatmul.mubr.msk.f32.vlgmr.msra.gmra.mxu0 %vm475_vm3, %v457_v19  ;;  %1564 = vmatprep.subr.mxu1 %v1614_v0 }
 0x277   :  { %1590 = vmatprep.mubr.msk.f32.mxu1 %vm1615_vm0, %v1614_v0  ;;  %1593 = vmatprep.subr.mxu0 %v1614_v0 }
 0x278   :  { %1609 = vmatprep.mubr.msk.f32.mxu0 %vm1615_vm0, %v1614_v0  ;;  %1565 = vmatpush3.msra.mxu1 %v1256_v20 }
 0x279   :  { %1566 = vmatprep.subr.mxu1 %v1614_v0  ;;  %1594 = vmatpush3.msra.mxu0 %v1277_v41 }
 0x27a   :  { %1567 = vmatpush3.msra.mxu1 %v1253_v22  ;;  %1595 = vmatprep.subr.mxu0 %v1614_v0 }
 0x27b   :  { %1568 = vmatprep.subr.mxu1 %v1614_v0  ;;  %1596 = vmatpush3.msra.mxu0 %v1276_v42 }
 0x27c   :  { %1569 = vmatpush3.msra.mxu1 %v1252_v23  ;;  %1597 = vmatprep.subr.mxu0 %v1614_v0 }
 0x27d   :  { %1570 = vmatprep.subr.mxu1 %v1614_v0  ;;  %1598 = vmatpush3.msra.mxu0 %v1273_v43 }
 0x27e   :  { %1571 = vmatpush3.msra.mxu1 %v1249_v25  ;;  %1599 = vmatprep.subr.mxu0 %v1614_v0 }
 0x27f   :  { %1572 = vmatprep.subr.mxu1 %v1614_v0  ;;  %1600 = vmatpush3.msra.mxu0 %v1272_v45 }
 0x280   :  { %1573 = vmatpush3.msra.mxu1 %v1248_v26  ;;  %1601 = vmatprep.subr.mxu0 %v1614_v0 }
 0x281   :  { %1574 = vmatprep.subr.mxu1 %v1614_v0  ;;  %1602 = vmatpush3.msra.mxu0 %v1269_v46 }
 0x282   :  { %1575 = vmatpush3.msra.mxu1 %v1245_v28  ;;  %1603 = vmatprep.subr.mxu0 %v1614_v0 }
 0x283   :  { %1576 = vmatprep.subr.mxu1 %v1614_v0  ;;  %1604 = vmatpush3.msra.mxu0 %v1268_v1 }
 0x284   :  { %1577 = vmatpush3.msra.mxu1 %v1244_v29  ;;  %1605 = vmatprep.subr.mxu0 %v1614_v0 }
 0x285   :  { %1578 = vmatprep.subr.mxu1 %v1614_v0  ;;  %1606 = vmatpush3.msra.mxu0 %v1265_v3 }
 0x286   :  { %1579 = vmatpush3.msra.mxu1 %v1241_v31  ;;  %1607 = vmatprep.subr.mxu0 %v1614_v0 }
 0x287   :  { %1580 = vmatprep.subr.mxu1 %v1614_v0  ;;  %1608 = vmatpush3.msra.mxu0 %v1264_v4 }
 0x288   :  { %1581 = vmatpush3.msra.mxu1 %v1240_v32 }
 0x289   :  { %1582 = vmatprep.subr.mxu1 %v1614_v0 }
 0x28a   :  { %1583 = vmatpush3.msra.mxu1 %v1237_v34 }
 0x28b   :  { %1584 = vmatprep.subr.mxu1 %v1614_v0 }
 0x28c   :  { %1585 = vmatpush3.msra.mxu1 %v1236_v35 }
 0x28d   :  { %1586 = vmatprep.subr.mxu1 %v1614_v0 }
 0x28e   :  { %1587 = vmatpush3.msra.mxu1 %v1233_v37 }
 0x28f   :  { %1588 = vmatprep.subr.mxu1 %v1614_v0 }
 0x290   :  { %1589 = vmatpush3.msra.mxu1 %v1232_v38 }
 0x322   :  { %v618_v47 = vpop.f32.mrf.mxu1 }
 0x324   :  { %v1524_v48 = vpop.f32.mrf.mxu1 }
 0x326   :  { %v545_v49 = vpop.f32.mrf.mxu0 }
 0x327   :  { %v619_v52 = vadd.f32 %v618_v47, %v545_v49 }
 0x328   :  { %v1513_v50 = vpop.f32.mrf.mxu0 }
 0x32e   :  { %v700_v51 = vpop.f32.mrf.mxu0 }
 0x32f   :  { %v783_v53 = vpop.f32.mrf.mxu1  ;;  %v704_v55 = vadd.f32 %v700_v51, %v619_v52 }
 0x330   :  { %v1535_v54 = vpop.f32.mrf.mxu0 }
 0x331   :  { %v1546_v56 = vpop.f32.mrf.mxu1  ;;  %v787_v57 = vadd.f32 %v783_v53, %v704_v55 }
 0x336   :  { %v866_v58 = vpop.f32.mrf.mxu0 }
 0x337   :  { %v870_v60 = vadd.f32 %v866_v58, %v787_v57 }
 0x338   :  { %v1557_v61 = vpop.f32.mrf.mxu0 }
 0x339   :  { %v878_v62 = vadd.f32 %v1130_v59, %v870_v60 }
 0x33b   :  { %v879_v63 = vmax.f32 %v878_v62, 0.0 }
 0x33d   :  { %1591 = vmatmul.mubr.f32.vlgmr.msra.gmra.mxu1 %v879_v63 }
 0x3fd   :  { %v985_v6 = vpop.f32.mrf.mxu1 }
 0x3fe   :  { %v986_v7 = vadd.f32 %v1131_v5, %v985_v6 }
 0x3ff   :  { %v1592_v8 = vpop.f32.mrf.mxu1 }
 0x400   :  { %v989_v9 = vmax.f32 %v986_v7, 0.0 }
 0x402   :  { %1610 = vmatmul.mubr.msk.f32.vlgmr.msra.gmra.mxu0 %vm72_vm1, %v989_v9 }
 0x4c2   :  { %v1082_v11 = vpop.f32.mrf.mxu0 }
 0x4c3   :  { %v1083_v12 = vadd.f32 %v1132_v10, %v1082_v11 }
 0x4c4   :  { %v1611_v13 = vpop.f32.mrf.mxu0 }
 0x4c5   :  { %1086 = vst [vmem:[%s1980_s13] sm:$0xff] %v1083_v12 }

</bundles_post_ra>
